<compile_context>
chip_gen: v7x
topology: tpu7x:2x2x1
jax: 0.10.0
libtpu: 0.0.40
codegen_flags: <defaults>
</compile_context>

<pallas_src>
import jax
import jax.numpy as jnp
from jax.experimental import pallas as pl
from jax.experimental.pallas import tpu as pltpu


def _round_up(x, m):
    return ((x + m - 1) // m) * m


# ----------------------------- Pallas kernel ------------------------------ #
def scalar_head_kernel(h_ref, w_ref, b_ref, o_ref):
    # h_ref: (TM, H)    hidden-state tile (native dtype: bf16 or f32)
    # w_ref: (1, H)     f32 value-head weight, lane-major, resident across the grid
    # b_ref: (1, 1)     f32 scalar bias in SMEM
    # o_ref: (1, 1, TM) f32 lane-dense output row
    h = h_ref[...].astype(jnp.float32)        # fp32 accumulate (no-op for f32 input)
    w = w_ref[...]                            # (1, H) broadcasts over sublanes
    row = jnp.sum(h * w, axis=-1)             # (TM,) — VPU multiply + lane reduction
    o_ref[0, 0] = row + b_ref[0, 0]           # lane-dense store, bias broadcast


def scalar_head(hidden_states, weight, bias, *, tile_m=512):
    """hidden_states: (B, S, H) (bf16 or fp32); weight: (H, 1) or (H,); bias: (1,).

    Returns (B, S) float32 scalar values (fp32 head semantics).
    """
    B, S, H = hidden_states.shape
    M = B * S

    # Keep native dtype: bf16 input halves the only HBM traffic that matters.
    h2 = hidden_states.reshape(M, H)

    # Big token tiles amortize per-step pipeline overhead (~0.35 us/step); never
    # larger than the (8-aligned) token count, always a multiple of 8 sublanes.
    # Default 512 keeps a double-buffered fp32 tile well inside v7x's 64 MiB VMEM
    # even at H=4096.
    tile_m = int(max(8, _round_up(min(int(tile_m), _round_up(M, 8)), 8)))
    grid = pl.cdiv(M, tile_m)
    m_pad = grid * tile_m
    if m_pad != M:
        h2 = jnp.pad(h2, ((0, m_pad - M), (0, 0)))   # tail tile, sliced off after

    w_row = weight.reshape(1, H).astype(jnp.float32)   # fp32 head weight, lane-major
    b = bias.reshape(1, 1).astype(jnp.float32)

    # Explicit scoped-VMEM budget: double-buffered input tile + small slack,
    # clamped to stay inside v7x's 64 MiB physical VMEM.
    itemsize = jnp.dtype(h2.dtype).itemsize
    vmem_needed = 2 * tile_m * H * itemsize + 4 * H * 4 + 4 * tile_m * 4 + (2 << 20)
    vmem_limit = int(min(64 * 1024 * 1024, max(vmem_needed, 16 * 1024 * 1024)))

    out = pl.pallas_call(
        scalar_head_kernel,
        out_shape=jax.ShapeDtypeStruct((grid, 1, tile_m), jnp.float32),
        grid_spec=pltpu.PrefetchScalarGridSpec(
            num_scalar_prefetch=0,
            grid=(grid,),
            in_specs=[
                pl.BlockSpec((tile_m, H), lambda i: (i, 0)),          # streamed hidden tile
                pl.BlockSpec((1, H), lambda i: (0, 0)),               # resident weight row
                pl.BlockSpec(memory_space=pltpu.MemorySpace.SMEM),    # scalar bias
            ],
            out_specs=pl.BlockSpec((1, 1, tile_m), lambda i: (i, 0, 0)),  # lane-dense rows
        ),
        compiler_params=pltpu.CompilerParams(
            dimension_semantics=("parallel",),   # megacore-shardable on v7x
            vmem_limit_bytes=vmem_limit,
        ),
    )(h2, w_row, b)

    return out.reshape(m_pad)[:M].reshape(B, S)


# --------------------------- synthetic backbone ---------------------------- #
def synthetic_last_hidden_state(input_ids, embed_table):
    # TODO(synk): the transformers.AutoModelForCausalLM backbone is an external
    # pretrained checkpoint with no clean in-script equivalent; a deterministic
    # embedding lookup stands in for base_model_output.hidden_states[-1].
    return embed_table[input_ids]  # (B, S, H)


def auto_model_with_scalar_head_forward(input_ids, params):
    last_hidden_state = synthetic_last_hidden_state(input_ids, params["embed_table"])
    return scalar_head(last_hidden_state, params["summary_w"], params["summary_b"])


# --------------------------------- main ------------------------------------ #
if __name__ == "__main__":
    B, S, H, VOCAB = 2, 8, 32, 64

    key = jax.random.PRNGKey(0)
    k_embed, k_w, k_b, k_ids = jax.random.split(key, 4)

    # Deterministic parameter init (shapes from ScalarHead: nn.Linear(H, 1, bias=True)).
    bound = 1.0 / jnp.sqrt(jnp.float32(H))
    params = {
        "embed_table": jax.random.normal(k_embed, (VOCAB, H), dtype=jnp.float32) * 0.02,
        "summary_w": jax.random.uniform(k_w, (H, 1), jnp.float32, -bound, bound),
        "summary_b": jax.random.uniform(k_b, (1,), jnp.float32, -bound, bound),
    }

    input_ids = jax.random.randint(k_ids, (B, S), 0, VOCAB, dtype=jnp.int32)

    scalar_values = auto_model_with_scalar_head_forward(input_ids, params)
    scalar_values = jax.block_until_ready(scalar_values)
    assert scalar_values.shape == (B, S)

    # Cross-check against a plain-JAX reference of the scalar head.
    hs = params["embed_table"][input_ids]
    ref = (hs.astype(jnp.float32) @ params["summary_w"] + params["summary_b"]).squeeze(-1)
    assert jnp.allclose(scalar_values, ref, atol=1e-5, rtol=1e-5)

    print("KERNEL_OK")
</pallas_src>

<mosaic_0001>
module attributes {stable_mosaic.version = 11 : i64} {
  func.func @scalar_head_kernel(%arg0: i32, %arg1: memref<16x32xf32, #tpu.memory_space<vmem>>, %arg2: memref<1x32xf32, #tpu.memory_space<vmem>>, %arg3: memref<1x1xf32, #tpu.memory_space<smem>>, %arg4: memref<1x1x16xf32, #tpu.memory_space<vmem>>) attributes {dimension_semantics = [#tpu.dimension_semantics<parallel>], iteration_bounds = array<i64: 1>, scalar_prefetch = 0 : i64, scratch_operands = 0 : i64, tpu.core_type = #tpu.core_type<tc>, window_params = [{transform_indices = @transform_0, window_bounds = array<i64: 16, 32>}, {pipeline_mode = #tpu.pipeline_mode<synchronous>, transform_indices = @transform_1, window_bounds = array<i64: 1, 32>}, {transform_indices = @transform_2, window_bounds = array<i64: 1, 1>}, {transform_indices = @transform_3, window_bounds = array<i64: 1, 1, 16>}]} {
    %c0 = arith.constant 0 : index
    %c0_0 = arith.constant 0 : index
    %0 = vector.load %arg1[%c0, %c0_0] : memref<16x32xf32, #tpu.memory_space<vmem>>, vector<16x32xf32>
    %c0_1 = arith.constant 0 : index
    %c0_2 = arith.constant 0 : index
    %1 = vector.load %arg2[%c0_1, %c0_2] : memref<1x32xf32, #tpu.memory_space<vmem>>, vector<1x32xf32>
    %2 = vector.broadcast %1 : vector<1x32xf32> to vector<16x32xf32>
    %3 = arith.mulf %0, %2 : vector<16x32xf32>
    %cst = arith.constant dense<0.000000e+00> : vector<16xf32>
    %4 = vector.multi_reduction <add>, %3, %cst [1] : vector<16x32xf32> to vector<16xf32>
    %c0_3 = arith.constant 0 : index
    %c0_4 = arith.constant 0 : index
    %5 = memref.load %arg3[%c0_3, %c0_4] : memref<1x1xf32, #tpu.memory_space<smem>>
    %6 = vector.broadcast %5 : f32 to vector<16xf32>
    %7 = arith.addf %4, %6 : vector<16xf32>
    %c0_5 = arith.constant 0 : index
    %c0_6 = arith.constant 0 : index
    %c0_7 = arith.constant 0 : index
    %8 = vector.load %arg4[%c0_5, %c0_6, %c0_7] : memref<1x1x16xf32, #tpu.memory_space<vmem>>, vector<1x1x16xf32>
    %9 = vector.shape_cast %8 : vector<1x1x16xf32> to vector<16xf32>
    %10 = vector.shape_cast %7 : vector<16xf32> to vector<1x1x16xf32>
    tpu.vector_store %arg4[%c0_5, %c0_6, %c0_7], %10 {strides = array<i32>} : memref<1x1x16xf32, #tpu.memory_space<vmem>>, vector<1x1x16xf32>,
    return
  }
  func.func @transform_0(%arg0: i32) -> (i32, i32) {
    %c0_i32 = arith.constant 0 : i32
    %c0_i32_0 = arith.constant 0 : i32
    return %arg0, %c0_i32 : i32, i32
  }
  func.func @transform_1(%arg0: i32) -> (i32, i32) {
    %c0_i32 = arith.constant 0 : i32
    %c0_i32_0 = arith.constant 0 : i32
    %c0_i32_1 = arith.constant 0 : i32
    return %c0_i32, %c0_i32_0 : i32, i32
  }
  func.func @transform_2(%arg0: i32) -> (i32, i32) {
    %c0_i32 = arith.constant 0 : i32
    %c0_i32_0 = arith.constant 0 : i32
    %c0_i32_1 = arith.constant 0 : i32
    return %c0_i32, %c0_i32_0 : i32, i32
  }
  func.func @transform_3(%arg0: i32) -> (i32, i32, i32) {
    %c0_i32 = arith.constant 0 : i32
    %c0_i32_0 = arith.constant 0 : i32
    %c0_i32_1 = arith.constant 0 : i32
    return %arg0, %c0_i32, %c0_i32_0 : i32, i32, i32
  }
}

</mosaic_0001>

<bundles_post_ra>
// kernel: tpu_custom_call.1
= control target key start
LH: loop header
LB: loop body
LE: loop exit
PB: predicated region body
PF: predicated region fallthrough
CT: control target
= control target key end

     0   :  { %9 = vsyncpa [#allocation4], 0  ;;  %s192_s0 = inlined_call_operand.hbm [shape: f32[16,32], index: 0, kind: input, shape index: {}]   ;;  %s193_s1 = inlined_call_operand.vmem [shape: f32[1,32], index: 1, kind: input, shape index: {}]   ;;  %s194_s2 = inlined_call_operand.<no memory space> [shape: f32[1,1], index: 2, kind: input, shape index: {}]   ;;  %s195_s3 = inlined_call_operand.hbm [shape: f32[1,1,16], index: 3, kind: output, shape index: {}]  }
   0x1   :  { %10 = vsyncpa [#allocation5], 0  ;;  %s138_s12 = smov [#allocation3]   ;;  %s90_s16 = scalar_lea.hbm %s192_s0, 256 }
   0x2   :  { %s16_s13 = sshll.u32 %s138_s12, 4  ;;  %p91_p0 = scmp.ne.s32.totalorder %s192_s0, %s90_s16  ;;  %s17_s13 = int_to_ptr.vmem [resolvable:$true] %s16_s13 }
   0x3   :  { %p94_p1 = scmp.lt.u32.totalorder %s90_s16, %s192_s0 }
   0x5   :  { %p96_p2 = pnand %p94_p1, %p91_p0 }
   0x7   :  { %99 = shalt.err (!%p96_p2)
}
   0x8   :  { %s100_s21 = scalar_lea.vmem %s17_s13, 256  ;;  %p105_p4 = scmp.lt.s32.totalorder %s17_s13, %s17_s13 }
   0x9   :  { %p101_p3 = scmp.ne.s32.totalorder %s17_s13, %s100_s21  ;;  %p106_p5 = scmp.lt.s32.totalorder %s100_s21, %s100_s21 }
   0xb   :  { %p107_p6 = por %p106_p5, %p105_p4 }
   0xd   :  { %p108_p7 = pnand %p107_p6, %p101_p3 }
   0xf   :  { %111 = shalt.err (!%p108_p7)
}
  0x10   :  { %s139_s22 = smov 128   ;;  %s140_s23 = smov 8  }
  0x11   :  { %22 = dma.hbm_to_vmem [thread:$0]  %s192_s0, 256, %s17_s13, [#allocation4], %s139_s22, %s139_s22, %s140_s23  }
  0x12   :  { %134 = dma.done.wait [#allocation4], 256  }
  0x13   :  { %135 = vsyncadd [#allocation4], 4294967040  ;;  %v30_v0 = vld [vmem:[#allocation3] sm:$0xff]  ;;  %vm41_vm0 = vcmask 261120   ;;  %v31_v2 = vld [vmem:[#allocation3 + $0x8] sm:$0xff]  ;;  %v54_v7 = vlaneseq  ;;  %v49_v11 = vstv %s194_s2  ;;  %vm65_vm1 = vcmask 130112  }
  0x14   :  { %v85_v1 = vld [vmem:[%s193_s1] ss:$0 sm:$0xff]  ;;  %s141_s1 = smov [#allocation6]   ;;  %vm68_vm2 = vcmask 122880  }
  0x15   :  { %v39_v3 = vmul.f32 %v85_v1, %v30_v0  ;;  %v40_v4 = vmul.f32 %v85_v1, %v31_v2  ;;  %v55_v8 = vand.u32 127, %v54_v7  ;;  %v57_v9 = vshrl.u32 %v54_v7, 7  ;;  %s76_s29 = sshll.u32 %s141_s1, 4  ;;  %s77_s29 = int_to_ptr.vmem [resolvable:$true] %s76_s29 }
  0x16   :  { %s112_s30 = scalar_lea.vmem %s77_s29, 16  ;;  %s116_s4 = scalar_lea.vmem %s77_s29, 32 }
  0x17   :  { %v42_v5 = vsel %vm41_vm0, %v39_v3, 0.0  ;;  %v45_v6 = vsel %vm41_vm0, %v40_v4, 0.0  ;;  %v60_v10 = vadd.s32 4294967288, %v55_v8  ;;  %v58_v13 = vsub.s32 %v55_v8, %v57_v9  ;;  %p113_p8 = scmp.ne.s32.totalorder %s77_s29, %s112_s30  ;;  %p117_p9 = scmp.lt.s32.totalorder %s77_s29, %s77_s29 }
  0x18   :  { %43 = vadd.xlane.f32.xlu0 %v42_v5  ;;  %p118_p10 = scmp.lt.s32.totalorder %s116_s4, %s112_s30 }
  0x19   :  { %v63_v15 = vsub.s32 %v60_v10, %v57_v9 }
  0x1a   :  { %p119_p11 = por %p118_p10, %p117_p9 }
  0x1c   :  { %46 = vadd.xlane.f32.xlu0 %v45_v6  ;;  %p120_p12 = pnand %p119_p11, %p113_p8 }
  0xa5   :  { %v44_v12 = vpop.xlane.xlu0 %43 }
  0xa6   :  { %v50_v14 = vadd.f32 %v49_v11, %v44_v12 }
  0xa8   :  { %v59_v18 = vrot.slane %v50_v14, %v58_v13 }
  0xa9   :  { %v47_v16 = vpop.xlane.xlu0 %46 }
  0xaa   :  { %v51_v17 = vadd.f32 %v49_v11, %v47_v16 }
  0xac   :  { %v64_v19 = vrot.slane %v51_v17, %v63_v15 }
  0xae   :  { %v66_v20 = vsel %vm65_vm1, %v64_v19, %v59_v18 }
  0xaf   :  { %69 = vst.msk [vmem:[#allocation6] sm:$0x1] %vm68_vm2, %v66_v20 }
  0xb0   :  { %123 = shalt.err (!%p120_p12)
}
  0xb1   :  { %s124_s6 = scalar_lea.hbm %s195_s3, 16 }
  0xb2   :  { %p125_p13 = scmp.ne.s32.totalorder %s195_s3, %s124_s6  ;;  %p128_p0 = scmp.lt.u32.totalorder %s124_s6, %s195_s3 }
  0xb4   :  { %p130_p1 = pnand %p128_p0, %p125_p13 }
  0xb6   :  { %133 = shalt.err (!%p130_p1)
}
  0xb7   :  { %79 = dma.vmem_to_hbm [thread:$0]  %s77_s29, 16, %s195_s3, [#allocation5]  }
  0xb8   :  { %136 = dma.done.wait [#allocation5], 16  }
  0xb9   :  { %137 = vsyncadd [#allocation5], 4294967280 }
  0xba   :  { %83 = vsyncpa [#allocation4], 1 }
  0xbb   :  { %84 = vsyncpa [#allocation5], 1 }

</bundles_post_ra>
